<compile_context>
chip_gen: v7x
topology: tpu7x:2x2x1
jax: 0.10.0
libtpu: 0.0.40
codegen_flags: <defaults>
</compile_context>

<pallas_src>
import functools

import jax
import jax.numpy as jnp
from jax.experimental import pallas as pl
from jax.experimental.pallas import tpu as pltpu

SUBLANES = 8
TILE_BYTES = 8 * 1024 * 1024          # ~8 MiB per block buffer
VMEM_LIMIT_BYTES = 48 * 1024 * 1024   # 2 in + 2 out bufs = 32 MiB -> headroom
MIN_GRID_STEPS = 4                    # keep grid splittable across v7x's 2 TCs


def _cdiv(a, b):
    return -(-a // b)


def _compute_dtype(dtype):
    """Native-dtype math on bf16-capable VPUs (v6e/v7x); f32 upcast otherwise."""
    d = jnp.dtype(dtype)
    if d.itemsize >= 4:
        return dtype
    try:
        kind = jax.devices()[0].device_kind.lower()
    except Exception:
        kind = ""
    if ("v6" in kind) or ("v7" in kind) or ("7x" in kind):
        return dtype          # v6e / v7x: bf16 VPU, stay narrow (less vreg pressure)
    return jnp.float32        # v5e and older/unknown: per-vreg upcast (free vs HBM)


def _brelu_math(x, t, alpha):
    # x < 0     : y = 0 -> alpha * x
    # 0 <= x<=t : y = x -> x
    # x > t     : y = t -> t + alpha * (x - t)
    y = jnp.clip(x, 0.0, t)
    return y + alpha * (x - y)


def _brelu_kernel(x_ref, o_ref, *, t, alpha, compute_dtype):
    x = x_ref[...].astype(compute_dtype)
    o_ref[...] = _brelu_math(x, t, alpha).astype(o_ref.dtype)


def _brelu_2d(x2d, t, alpha, compute_dtype):
    """Pallas call over a lane-dense (rows, width) slab; width % 128 == 0."""
    rows, width = x2d.shape
    dtype = x2d.dtype
    itemsize = jnp.dtype(dtype).itemsize

    # ~TILE_BYTES per block buffer, rows rounded to a sublane multiple.
    target_rows = max(SUBLANES,
                      (TILE_BYTES // (width * itemsize)) // SUBLANES * SUBLANES)
    # Keep >= MIN_GRID_STEPS grid steps so megacore sharding has work per TC.
    cap_rows = max(SUBLANES,
                   _cdiv(_cdiv(rows, MIN_GRID_STEPS), SUBLANES) * SUBLANES)
    block_rows = min(target_rows, cap_rows, rows)   # == rows for small arrays
    grid = _cdiv(rows, block_rows)                  # partial last block is masked

    kernel = functools.partial(_brelu_kernel, t=float(t), alpha=float(alpha),
                               compute_dtype=compute_dtype)

    cost = pl.CostEstimate(
        flops=5 * rows * width,
        transcendentals=0,
        bytes_accessed=2 * rows * width * itemsize,
    )

    return pl.pallas_call(
        kernel,
        out_shape=jax.ShapeDtypeStruct((rows, width), dtype),
        grid_spec=pltpu.PrefetchScalarGridSpec(
            num_scalar_prefetch=0,
            grid=(grid,),
            in_specs=[pl.BlockSpec((block_rows, width), lambda i: (i, 0))],
            out_specs=pl.BlockSpec((block_rows, width), lambda i: (i, 0)),
        ),
        compiler_params=pltpu.CompilerParams(
            dimension_semantics=("parallel",),
            vmem_limit_bytes=VMEM_LIMIT_BYTES,
        ),
        cost_estimate=cost,
    )(x2d)


def brelu(x, t, alpha=0.1):
    """Bounded leaky ReLU over an arbitrary-shape float array (e.g. NCHW)."""
    if t < 0:
        # clip(x, 0, t) with t < 0 would silently diverge from the 3-branch def.
        raise ValueError("BRelu threshold t must be >= 0.")

    orig_shape = x.shape
    dtype = x.dtype
    n = x.size
    xf = x.reshape(-1)                       # metadata-only for contiguous NCHW
    compute_dtype = _compute_dtype(dtype)

    # Prefer a lane-dense width (multiple of 128) that divides n exactly:
    # single pallas_call, zero pad/slice/concat passes.
    width = None
    for w in (1024, 512, 256, 128):
        if n >= w and n % w == 0:
            width = w
            break

    if width is not None:
        out = _brelu_2d(xf.reshape(n // width, width), t, alpha,
                        compute_dtype).reshape(-1)
        return out.reshape(orig_shape)

    # Non-128-divisible size: kernel on the lane-aligned bulk, tiny jnp tail.
    width = 1024
    bulk = (n // width) * width
    parts = []
    if bulk > 0:
        parts.append(
            _brelu_2d(xf[:bulk].reshape(bulk // width, width), t, alpha,
                      compute_dtype).reshape(-1))
    xt = xf[bulk:].astype(compute_dtype)     # < 1024 elements
    parts.append(_brelu_math(xt, float(t), float(alpha)).astype(dtype))
    out = jnp.concatenate(parts) if len(parts) > 1 else parts[0]
    return out.reshape(orig_shape)


def brelu_reference(x, t, alpha=0.1):
    """Pure-JAX reference mirroring the PyTorch autograd.Function forward."""
    xf = x.astype(jnp.float32)
    l = (xf < 0.0).astype(jnp.float32)
    r = (xf > t).astype(jnp.float32)
    mask = jnp.sign(l + r)
    return l * xf * alpha + (1.0 - mask) * xf + r * ((xf - t) * alpha + t)


# TODO(synk): backward pass of b_relu (custom autograd) not implemented; forward only.

if __name__ == "__main__":
    key = jax.random.PRNGKey(0)
    t = 3.0  # BRelu(t=3)

    # NCHW input, scaled so values land in all three regions (<0, [0,t], >t).
    x = jax.random.normal(key, (2, 4, 16, 16), dtype=jnp.float32) * 4.0
    out = jax.block_until_ready(brelu(x, t))
    assert out.shape == x.shape and out.dtype == x.dtype
    assert jnp.allclose(out, brelu_reference(x, t), atol=1e-6, rtol=1e-6)

    # 512-lane fallback (n % 1024 != 0 but n % 512 == 0): still a single kernel.
    x2 = jax.random.normal(jax.random.PRNGKey(1), (2, 3, 16, 16),
                           dtype=jnp.float32) * 4.0
    out2 = jax.block_until_ready(brelu(x2, t))
    assert jnp.allclose(out2, brelu_reference(x2, t), atol=1e-6, rtol=1e-6)

    # Non-128-divisible size: lane-aligned bulk through the kernel + jnp tail
    # (also exercises the masked partial last grid block).
    x3 = jax.random.normal(jax.random.PRNGKey(2), (5, 7, 9, 33),
                           dtype=jnp.float32) * 4.0
    out3 = jax.block_until_ready(brelu(x3, t))
    assert out3.shape == x3.shape
    assert jnp.allclose(out3, brelu_reference(x3, t), atol=1e-6, rtol=1e-6)

    # Native bf16 I/O (bf16 math on v6e/v7x, f32 per-vreg upcast on v5e).
    x4 = (jax.random.normal(jax.random.PRNGKey(3), (2, 4, 16, 16)) * 4.0
          ).astype(jnp.bfloat16)
    out4 = jax.block_until_ready(brelu(x4, t))
    assert out4.dtype == jnp.bfloat16
    assert jnp.allclose(out4.astype(jnp.float32), brelu_reference(x4, t),
                        atol=2e-2, rtol=2e-2)

    print("KERNEL_OK")
</pallas_src>

<mosaic_0001>
module attributes {stable_mosaic.version = 11 : i64} {
  func.func @_brelu_kernel(%arg0: i32, %arg1: memref<2x1024xf32, #tpu.memory_space<vmem>>, %arg2: memref<2x1024xf32, #tpu.memory_space<vmem>>) attributes {dimension_semantics = [#tpu.dimension_semantics<parallel>], iteration_bounds = array<i64: 1>, scalar_prefetch = 0 : i64, scratch_operands = 0 : i64, tpu.core_type = #tpu.core_type<tc>, window_params = [{transform_indices = @transform_0, window_bounds = array<i64: 2, 1024>}, {transform_indices = @transform_1, window_bounds = array<i64: 2, 1024>}]} {
    %c0 = arith.constant 0 : index
    %c0_0 = arith.constant 0 : index
    %0 = vector.load %arg1[%c0, %c0_0] : memref<2x1024xf32, #tpu.memory_space<vmem>>, vector<2x1024xf32>
    %cst = arith.constant 0.000000e+00 : f32
    %cst_1 = arith.constant 3.000000e+00 : f32
    %1 = vector.broadcast %cst : f32 to vector<2x1024xf32>
    %2 = arith.maximumf %1, %0 : vector<2x1024xf32>
    %3 = vector.broadcast %cst_1 : f32 to vector<2x1024xf32>
    %4 = arith.minimumf %3, %2 : vector<2x1024xf32>
    %5 = arith.subf %0, %4 : vector<2x1024xf32>
    %cst_2 = arith.constant 1.000000e-01 : f32
    %6 = vector.broadcast %cst_2 : f32 to vector<2x1024xf32>
    %7 = arith.mulf %6, %5 : vector<2x1024xf32>
    %8 = arith.addf %4, %7 : vector<2x1024xf32>
    %c0_3 = arith.constant 0 : index
    %c0_4 = arith.constant 0 : index
    %9 = vector.load %arg2[%c0_3, %c0_4] : memref<2x1024xf32, #tpu.memory_space<vmem>>, vector<2x1024xf32>
    tpu.vector_store %arg2[%c0_3, %c0_4], %8 {strides = array<i32>} : memref<2x1024xf32, #tpu.memory_space<vmem>>, vector<2x1024xf32>,
    return
  }
  func.func @transform_0(%arg0: i32) -> (i32, i32) {
    %c0_i32 = arith.constant 0 : i32
    %c0_i32_0 = arith.constant 0 : i32
    return %arg0, %c0_i32 : i32, i32
  }
  func.func @transform_1(%arg0: i32) -> (i32, i32) {
    %c0_i32 = arith.constant 0 : i32
    %c0_i32_0 = arith.constant 0 : i32
    return %arg0, %c0_i32 : i32, i32
  }
}

</mosaic_0001>

<bundles_post_ra>
// kernel: tpu_custom_call.1
= control target key start
LH: loop header
LB: loop body
LE: loop exit
PB: predicated region body
PF: predicated region fallthrough
CT: control target
= control target key end

     0   :  { %6 = vsyncpa [#allocation3], 0  ;;  %s136_s0 = inlined_call_operand.hbm [shape: f32[2,1024], index: 0, kind: input, shape index: {}]   ;;  %s137_s1 = inlined_call_operand.hbm [shape: f32[2,1024], index: 1, kind: output, shape index: {}]  }
   0x1   :  { %7 = vsyncpa [#allocation4], 0  ;;  %s100_s6 = smov [#allocation2]   ;;  %s52_s10 = scalar_lea.hbm %s136_s0, 256 }
   0x2   :  { %s14_s7 = sshll.u32 %s100_s6, 4  ;;  %p53_p0 = scmp.ne.s32.totalorder %s136_s0, %s52_s10  ;;  %s15_s7 = int_to_ptr.vmem [resolvable:$true] %s14_s7 }
   0x3   :  { %p56_p1 = scmp.lt.u32.totalorder %s52_s10, %s136_s0 }
   0x5   :  { %p58_p2 = pnand %p56_p1, %p53_p0 }
   0x7   :  { %61 = shalt.err (!%p58_p2)
}
   0x8   :  { %s62_s15 = scalar_lea.vmem %s15_s7, 256  ;;  %p67_p4 = scmp.lt.s32.totalorder %s15_s7, %s15_s7 }
   0x9   :  { %p63_p3 = scmp.ne.s32.totalorder %s15_s7, %s62_s15  ;;  %p68_p5 = scmp.lt.s32.totalorder %s62_s15, %s62_s15 }
   0xb   :  { %p69_p6 = por %p68_p5, %p67_p4 }
   0xd   :  { %p70_p7 = pnand %p69_p6, %p63_p3 }
   0xf   :  { %73 = shalt.err (!%p70_p7)
}
  0x10   :  { %17 = dma.hbm_to_vmem [thread:$0]  %s136_s0, 256, %s15_s7, [#allocation3]  }
  0x11   :  { %96 = dma.done.wait [#allocation3], 256  }
  0x12   :  { %97 = vsyncadd [#allocation3], 4294967040  ;;  %v21_v0 = vld [vmem:[#allocation2] sm:$0xff]  ;;  %v22_v1 = vld [vmem:[#allocation2 + $0x8] sm:$0xff]  ;;  %s101_s18 = smov [#allocation5]  }
  0x13   :  { %v23_v2 = vmax.f32 %v21_v0, 0.0  ;;  %v24_v3 = vmax.f32 %v22_v1, 0.0  ;;  %s41_s19 = sshll.u32 %s101_s18, 4  ;;  %s42_s19 = int_to_ptr.vmem [resolvable:$true] %s41_s19 }
  0x14   :  { %s74_s0 = scalar_lea.vmem %s42_s19, 256  ;;  %p79_p9 = scmp.lt.s32.totalorder %s42_s19, %s42_s19 }
  0x15   :  { %v25_v4 = vmin.f32 %v23_v2, 3.0  ;;  %v26_v5 = vmin.f32 %v24_v3, 3.0  ;;  %p75_p8 = scmp.ne.s32.totalorder %s42_s19, %s74_s0  ;;  %p80_p10 = scmp.lt.s32.totalorder %s74_s0, %s74_s0 }
  0x17   :  { %v27_v6 = vsub.f32 %v21_v0, %v25_v4  ;;  %v28_v7 = vsub.f32 %v22_v1, %v26_v5  ;;  %p81_p11 = por %p80_p10, %p79_p9 }
  0x19   :  { %v29_v8 = vmul.f32 0.1, %v27_v6  ;;  %v30_v9 = vmul.f32 0.1, %v28_v7  ;;  %p82_p12 = pnand %p81_p11, %p75_p8 }
  0x1b   :  { %v31_v10 = vadd.f32 %v29_v8, %v25_v4  ;;  %v32_v11 = vadd.f32 %v30_v9, %v26_v5 }
  0x1d   :  { %33 = vst [vmem:[#allocation5] sm:$0xff] %v31_v10  ;;  %34 = vst [vmem:[#allocation5 + $0x8] sm:$0xff] %v32_v11 }
  0x1e   :  { %85 = shalt.err (!%p82_p12)
}
  0x1f   :  { %s86_s22 = scalar_lea.hbm %s137_s1, 256 }
  0x20   :  { %p87_p13 = scmp.ne.s32.totalorder %s137_s1, %s86_s22  ;;  %p90_p0 = scmp.lt.u32.totalorder %s86_s22, %s137_s1 }
  0x22   :  { %p92_p1 = pnand %p90_p0, %p87_p13 }
  0x24   :  { %95 = shalt.err (!%p92_p1)
}
  0x25   :  { %44 = dma.vmem_to_hbm [thread:$0]  %s42_s19, 256, %s137_s1, [#allocation4]  }
  0x26   :  { %98 = dma.done.wait [#allocation4], 256  }
  0x27   :  { %99 = vsyncadd [#allocation4], 4294967040 }
  0x28   :  { %48 = vsyncpa [#allocation3], 1 }
  0x29   :  { %49 = vsyncpa [#allocation4], 1 }

</bundles_post_ra>
